<compile_context>
chip_gen: v7x
topology: tpu7x:2x2x1
jax: 0.10.0
libtpu: 0.0.40
codegen_flags: <defaults>
</compile_context>

<pallas_src>
import jax
import jax.numpy as jnp
from jax.experimental import pallas as pl
from jax.experimental.pallas import tpu as pltpu


# ---------------------------------------------------------------------------
# Kernels
# ---------------------------------------------------------------------------
def _fused_linear_relu_kernel(x_ref, w_ref, b_ref, o_ref):
    """Whole problem in VMEM: one matmul, fused bias + ReLU epilogue."""
    out = jnp.dot(x_ref[...], w_ref[...], preferred_element_type=jnp.float32)
    o_ref[...] = jnp.maximum(out + b_ref[...], 0.0).astype(o_ref.dtype)


def _tiled_fused_kernel(x_ref, w_ref, b_ref, o_ref):
    """Tiled over (M, N); K fits one tile -> no accumulator scratch."""
    out = jnp.dot(x_ref[...], w_ref[...], preferred_element_type=jnp.float32)
    o_ref[...] = jnp.maximum(out + b_ref[...], 0.0).astype(o_ref.dtype)


def _tiled_acc_kernel(x_ref, w_ref, b_ref, o_ref, acc_ref):
    """Tiled over (M, N, K); f32 accumulator, fused epilogue at last k."""
    k = pl.program_id(2)

    @pl.when(k == 0)
    def _():
        acc_ref[...] = jnp.zeros_like(acc_ref)

    acc_ref[...] += jnp.dot(
        x_ref[...], w_ref[...], preferred_element_type=jnp.float32
    )

    @pl.when(k == pl.num_programs(2) - 1)
    def _():
        o_ref[...] = jnp.maximum(acc_ref[...] + b_ref[...], 0.0).astype(o_ref.dtype)


# ---------------------------------------------------------------------------
# Wrapper
# ---------------------------------------------------------------------------
_SINGLE_SHOT_LIMIT = 2 * 1024 * 1024    # operand bytes for the un-gridded path
_TILE_VMEM_BUDGET = 20 * 1024 * 1024    # double-buffered tile working set target
_VMEM_LIMIT_BYTES = 32 * 1024 * 1024    # scoped VMEM limit (safe on v5e/v6e/v7x)


def _round_up(x, m):
    return ((x + m - 1) // m) * m


def _pick_tile(dim, candidates):
    for c in candidates:
        if dim % c == 0:
            return c
    return dim


def _can_halve(t, full, align):
    h = t // 2
    return h >= align and h % align == 0 and full % h == 0


def text_nn_forward(x, w_t, b, *, compute_dtype=jnp.bfloat16, force_tiled=False):
    """relu(x @ w_t + b).

    x:   [M, K]     activations
    w_t: [K, N]     weight, pre-transposed from PyTorch's [N, K] (once, at load)
    b:   [N]/[1,N]  bias (kept f32, added after the f32 accumulation)
    """
    M, K = x.shape
    Kw, N = w_t.shape
    assert Kw == K
    b = jnp.asarray(b, jnp.float32).reshape(1, N)
    out_dtype = x.dtype

    # bf16 operands: half the HBM read on the weight stream, native MXU rate.
    if compute_dtype is not None:
        xc = x.astype(compute_dtype)
        wc = w_t.astype(compute_dtype)
    else:
        xc, wc = x, w_t

    xb = jnp.dtype(xc.dtype).itemsize
    wb = jnp.dtype(wc.dtype).itemsize
    ob = jnp.dtype(out_dtype).itemsize
    total_bytes = M * K * xb + K * N * wb + N * 4 + M * N * ob

    # ---- Path 1: tiny problem -> single fused un-gridded call ---------------
    if not force_tiled and total_bytes <= _SINGLE_SHOT_LIMIT:
        return pl.pallas_call(
            _fused_linear_relu_kernel,
            out_shape=jax.ShapeDtypeStruct((M, N), out_dtype),
        )(xc, wc, b)

    # ---- Path 2: tiled & pipelined -------------------------------------------
    # Pad to (8,128)-friendly shapes: zero-padding K doesn't change the matmul;
    # padded M rows / N cols are sliced off at the end. Keeps every tile
    # aligned and the output store lane-dense (no masked vst).
    Mp, Kp, Np = _round_up(M, 8), _round_up(K, 128), _round_up(N, 128)
    if (Mp, Kp) != (M, K):
        xc = jnp.pad(xc, ((0, Mp - M), (0, Kp - K)))
    if (Kp, Np) != (K, N):
        wc = jnp.pad(wc, ((0, Kp - K), (0, Np - N)))
    if Np != N:
        b = jnp.pad(b, ((0, 0), (0, Np - N)))

    # Reuse-aware tile choice: grow tm first (weight tile re-fetched M/tm
    # times), single K tile whenever K is modest (skips the accumulator).
    tm = Mp if Mp <= 512 else _pick_tile(Mp, (512, 256, 128, 64, 32, 16, 8))
    tn = Np if Np <= 1024 else _pick_tile(Np, (1024, 512, 256, 128))
    tk = Kp if Kp <= 1024 else _pick_tile(Kp, (1024, 512, 256, 128))

    def footprint(tm_, tn_, tk_):
        f = 2 * (tm_ * tk_ * xb + tk_ * tn_ * wb + tn_ * 4) + 2 * (tm_ * tn_ * ob)
        if Kp // tk_ > 1:
            f += tm_ * tn_ * 4  # f32 accumulator scratch
        return f

    # VMEM-budget-aware shrink (keeps double-buffering alive on v7x's 64 MiB).
    while footprint(tm, tn, tk) > _TILE_VMEM_BUDGET:
        if _can_halve(tk, Kp, 128):
            tk //= 2
        elif _can_halve(tn, Np, 128):
            tn //= 2
        elif _can_halve(tm, Mp, 8):
            tm //= 2
        else:
            break

    nm, nn_, nk = Mp // tm, Np // tn, Kp // tk

    # Ensure a few steps on a parallel axis: pipelines the weight DMA behind
    # the MXU and keeps both v7x TensorCores busy. Prefer splitting N.
    while nm * nn_ < 4 and _can_halve(tn, Np, 128):
        tn //= 2
        nn_ = Np // tn
    while nm * nn_ < 2 and _can_halve(tm, Mp, 8):
        tm //= 2
        nm = Mp // tm

    if nk == 1:
        out_p = pl.pallas_call(
            _tiled_fused_kernel,
            out_shape=jax.ShapeDtypeStruct((Mp, Np), out_dtype),
            grid_spec=pltpu.PrefetchScalarGridSpec(
                num_scalar_prefetch=0,
                grid=(nm, nn_),
                in_specs=[
                    pl.BlockSpec((tm, Kp), lambda i, j: (i, 0)),   # x tile
                    pl.BlockSpec((Kp, tn), lambda i, j: (0, j)),   # w tile
                    pl.BlockSpec((1, tn), lambda i, j: (0, j)),    # bias tile
                ],
                out_specs=pl.BlockSpec((tm, tn), lambda i, j: (i, j)),
            ),
            compiler_params=pltpu.CompilerParams(
                dimension_semantics=("parallel", "parallel"),
                vmem_limit_bytes=_VMEM_LIMIT_BYTES,
            ),
        )(xc, wc, b)
    else:
        out_p = pl.pallas_call(
            _tiled_acc_kernel,
            out_shape=jax.ShapeDtypeStruct((Mp, Np), out_dtype),
            grid_spec=pltpu.PrefetchScalarGridSpec(
                num_scalar_prefetch=0,
                grid=(nm, nn_, nk),
                in_specs=[
                    pl.BlockSpec((tm, tk), lambda i, j, k: (i, k)),   # x tile
                    pl.BlockSpec((tk, tn), lambda i, j, k: (k, j)),   # w tile
                    pl.BlockSpec((1, tn), lambda i, j, k: (0, j)),    # bias tile
                ],
                out_specs=pl.BlockSpec((tm, tn), lambda i, j, k: (i, j)),
                scratch_shapes=[pltpu.VMEM((tm, tn), jnp.float32)],
            ),
            compiler_params=pltpu.CompilerParams(
                dimension_semantics=("parallel", "parallel", "arbitrary"),
                vmem_limit_bytes=_VMEM_LIMIT_BYTES,
            ),
        )(xc, wc, b)

    if (Mp, Np) != (M, N):
        out_p = out_p[:M, :N]
    return out_p


def reference(x, w_t, b):
    return jnp.maximum(x @ w_t + b.reshape(1, -1), 0.0)


# ---------------------------------------------------------------------------
# Test
# ---------------------------------------------------------------------------
if __name__ == "__main__":
    key = jax.random.PRNGKey(0)
    k1, k2, k3, k4, k5, k6, k7, k8, k9 = jax.random.split(key, 9)

    # --- Small TextNN-like shapes: single-shot fused path --------------------
    batch, input_dim, output_dim = 8, 256, 128
    x = jax.random.normal(k1, (batch, input_dim), dtype=jnp.float32)
    # PyTorch convention: weight [output_dim, input_dim], bias [output_dim].
    w = jax.random.normal(k2, (output_dim, input_dim), dtype=jnp.float32) * 0.02
    b = jax.random.normal(k3, (output_dim,), dtype=jnp.float32) * 0.02
    w_t = w.T  # transpose ONCE ("at parameter load time"), not per forward

    out = text_nn_forward(x, w_t, b)
    jax.block_until_ready(out)
    ref = reference(x, w_t, b)
    assert out.shape == (batch, output_dim)
    assert jnp.allclose(out, ref, atol=2e-2, rtol=2e-2), "mismatch (fused path)"

    # --- Larger shapes: tiled path with K-axis accumulation ------------------
    M2, K2, N2 = 64, 2048, 1024
    x2 = jax.random.normal(k4, (M2, K2), dtype=jnp.float32)
    w2 = jax.random.normal(k5, (N2, K2), dtype=jnp.float32) * 0.02
    b2 = jax.random.normal(k6, (N2,), dtype=jnp.float32) * 0.02
    w2_t = w2.T

    out2 = text_nn_forward(x2, w2_t, b2, force_tiled=True)
    jax.block_until_ready(out2)
    ref2 = reference(x2, w2_t, b2)
    assert out2.shape == (M2, N2)
    assert jnp.allclose(out2, ref2, atol=2e-2, rtol=2e-2), "mismatch (acc path)"

    # --- Non-(8,128)-aligned shapes: exercises wrapper padding + slicing -----
    M3, K3, N3 = 10, 300, 200
    x3 = jax.random.normal(k7, (M3, K3), dtype=jnp.float32)
    w3 = jax.random.normal(k8, (N3, K3), dtype=jnp.float32) * 0.02
    b3 = jax.random.normal(k9, (N3,), dtype=jnp.float32) * 0.02
    w3_t = w3.T

    out3 = text_nn_forward(x3, w3_t, b3, force_tiled=True)
    jax.block_until_ready(out3)
    ref3 = reference(x3, w3_t, b3)
    assert out3.shape == (M3, N3)
    assert jnp.allclose(out3, ref3, atol=2e-2, rtol=2e-2), "mismatch (padded path)"

    print("KERNEL_OK")
</pallas_src>

<mosaic_0001>
module attributes {stable_mosaic.version = 11 : i64} {
  func.func @_fused_linear_relu_kernel(%arg0: memref<8x256xbf16, #tpu.memory_space<vmem>>, %arg1: memref<256x128xbf16, #tpu.memory_space<vmem>>, %arg2: memref<1x128xf32, #tpu.memory_space<vmem>>, %arg3: memref<8x128xf32, #tpu.memory_space<vmem>>) attributes {dimension_semantics = [], scalar_prefetch = 0 : i64, scratch_operands = 0 : i64, tpu.core_type = #tpu.core_type<tc>} {
    %c0 = arith.constant 0 : index
    %c0_0 = arith.constant 0 : index
    %0 = vector.load %arg0[%c0, %c0_0] : memref<8x256xbf16, #tpu.memory_space<vmem>>, vector<8x256xbf16>
    %c0_1 = arith.constant 0 : index
    %c0_2 = arith.constant 0 : index
    %1 = vector.load %arg1[%c0_1, %c0_2] : memref<256x128xbf16, #tpu.memory_space<vmem>>, vector<256x128xbf16>
    %cst = arith.constant dense<0.000000e+00> : vector<8x128xf32>
    %2 = tpu.matmul %0, %1, %cst {dimension_numbers = #tpu.dot_dimension_numbers<[1], [0], [0], [1], [0, 0, 1, 1], [], []>} : vector<8x256xbf16>, vector<256x128xbf16>, vector<8x128xf32> -> vector<8x128xf32>
    %c0_3 = arith.constant 0 : index
    %c0_4 = arith.constant 0 : index
    %3 = vector.load %arg2[%c0_3, %c0_4] : memref<1x128xf32, #tpu.memory_space<vmem>>, vector<1x128xf32>
    %4 = vector.broadcast %3 : vector<1x128xf32> to vector<8x128xf32>
    %5 = arith.addf %2, %4 : vector<8x128xf32>
    %cst_5 = arith.constant 0.000000e+00 : f32
    %6 = vector.broadcast %cst_5 : f32 to vector<8x128xf32>
    %7 = arith.maximumf %5, %6 : vector<8x128xf32>
    %c0_6 = arith.constant 0 : index
    %c0_7 = arith.constant 0 : index
    %8 = vector.load %arg3[%c0_6, %c0_7] : memref<8x128xf32, #tpu.memory_space<vmem>>, vector<8x128xf32>
    tpu.vector_store %arg3[%c0_6, %c0_7], %7 {strides = array<i32>} : memref<8x128xf32, #tpu.memory_space<vmem>>, vector<8x128xf32>,
    return
  }
}

</mosaic_0001>

<bundles_post_ra>
// kernel: tpu_custom_call.1
= control target key start
LH: loop header
LB: loop body
LE: loop exit
PB: predicated region body
PF: predicated region fallthrough
CT: control target
= control target key end

     0   :  { %8 = vsyncpa [#allocation3], 0  ;;  %s450_s0 = inlined_call_operand.hbm [shape: bf16[8,256], index: 0, kind: input, shape index: {}]   ;;  %s451_s1 = inlined_call_operand.hbm [shape: bf16[256,128], index: 1, kind: input, shape index: {}]   ;;  %s452_s2 = inlined_call_operand.vmem [shape: f32[1,128], index: 2, kind: input, shape index: {}]   ;;  %s453_s3 = inlined_call_operand.hbm [shape: f32[8,128], index: 3, kind: output, shape index: {}]  }
   0x1   :  { %9 = vsyncpa [#allocation6], 0 }
   0x2   :  { %10 = vsyncpa [#allocation4], 0  ;;  %s379_s12 = smov [#allocation2]   ;;  %s380_s14 = smov [#allocation5]  }
   0x3   :  { %s17_s13 = sshll.u32 %s379_s12, 4  ;;  %s26_s15 = sshll.u32 %s380_s14, 4  ;;  %s18_s13 = int_to_ptr.vmem [resolvable:$true] %s17_s13  ;;  %s404_s15 = int_to_ptr.vmem [resolvable:$true] %s26_s15 }
   0x4   :  { %s307_s18 = scalar_lea.hbm %s450_s0, 128 }
   0x5   :  { %p308_p0 = scmp.ne.s32.totalorder %s450_s0, %s307_s18  ;;  %p311_p1 = scmp.lt.u32.totalorder %s307_s18, %s450_s0 }
   0x7   :  { %p313_p2 = pnand %p311_p1, %p308_p0 }
   0x9   :  { %316 = shalt.err (!%p313_p2)
}
   0xa   :  { %s317_s23 = scalar_lea.vmem %s18_s13, 128  ;;  %p322_p4 = scmp.lt.s32.totalorder %s18_s13, %s18_s13 }
   0xb   :  { %p318_p3 = scmp.ne.s32.totalorder %s18_s13, %s317_s23  ;;  %p323_p5 = scmp.lt.s32.totalorder %s317_s23, %s317_s23 }
   0xd   :  { %p324_p6 = por %p323_p5, %p322_p4 }
   0xf   :  { %p325_p7 = pnand %p324_p6, %p318_p3 }
  0x11   :  { %328 = shalt.err (!%p325_p7)
}
  0x12   :  { %20 = dma.hbm_to_vmem [thread:$0]  %s450_s0, 128, %s18_s13, [#allocation3]  }
  0x13   :  { %s329_s28 = scalar_lea.hbm %s451_s1, 2048 }
  0x14   :  { %p330_p8 = scmp.ne.s32.totalorder %s451_s1, %s329_s28  ;;  %p333_p9 = scmp.lt.u32.totalorder %s329_s28, %s451_s1 }
  0x16   :  { %p335_p10 = pnand %p333_p9, %p330_p8 }
  0x18   :  { %338 = shalt.err (!%p335_p10)
}
  0x19   :  { %s339_s6 = scalar_lea.vmem %s404_s15, 2048  ;;  %p344_p12 = scmp.lt.s32.totalorder %s404_s15, %s404_s15 }
  0x1a   :  { %p340_p11 = scmp.ne.s32.totalorder %s404_s15, %s339_s6  ;;  %p345_p13 = scmp.lt.s32.totalorder %s339_s6, %s339_s6 }
  0x1c   :  { %p346_p0 = por %p345_p13, %p344_p12 }
  0x1e   :  { %p347_p1 = pnand %p346_p0, %p340_p11 }
  0x20   :  { %350 = shalt.err (!%p347_p1)
}
  0x21   :  { %s381_s0 = smov 64   ;;  %s382_s7 = smov 4  }
  0x22   :  { %32 = dma.hbm_to_vmem [thread:$0]  %s451_s1, 2048, %s404_s15, [#allocation6], %s381_s0, %s381_s0, %s382_s7  }
  0x23   :  { %373 = dma.done.wait [#allocation3], 128  }
  0x24   :  { %374 = vsyncadd [#allocation3], 4294967168 }
  0x25   :  { %375 = dma.done.wait [#allocation6], 2048  }
  0x26   :  { %376 = vsyncadd [#allocation6], 4294965248  ;;  %v289_v0 = vld [vmem:[#allocation5 + $0x40] sm:$0xff]   ;;  %v291_v2 = vld [vmem:[#allocation5 + $0x48] sm:$0xff]   ;;  %s383_s11 = smov [#allocation7]  }
  0x27   :  { %v290_v1 = vld [vmem:[#allocation5] sm:$0xff]   ;;  %262 = vmatprep.subr.bf16.mxu0 %v289_v0  ;;  %v292_v3 = vld [vmem:[#allocation5 + $0x8] sm:$0xff]   ;;  %v293_v4 = vld [vmem:[#allocation5 + $0x50] sm:$0xff]   ;;  %s233_s12 = sshll.u32 %s383_s11, 4  ;;  %s234_s12 = int_to_ptr.vmem [resolvable:$true] %s233_s12 }
  0x28   :  { %263 = vmatpush3.bf16.msra.mxu0 %v290_v1  ;;  %v294_v5 = vld [vmem:[#allocation5 + $0x10] sm:$0xff]   ;;  %v295_v6 = vld [vmem:[#allocation5 + $0x58] sm:$0xff]   ;;  %v297_v8 = vld [vmem:[#allocation5 + $0x60] sm:$0xff]   ;;  %s351_s13 = scalar_lea.vmem %s234_s12, 128  ;;  %p356_p3 = scmp.lt.s32.totalorder %s234_s12, %s234_s12 }
  0x29   :  { %264 = vmatprep.subr.bf16.mxu0 %v291_v2  ;;  %v296_v7 = vld [vmem:[#allocation5 + $0x18] sm:$0xff]   ;;  %v298_v9 = vld [vmem:[#allocation5 + $0x20] sm:$0xff]   ;;  %v299_v10 = vld [vmem:[#allocation5 + $0x68] sm:$0xff]   ;;  %p352_p2 = scmp.ne.s32.totalorder %s234_s12, %s351_s13  ;;  %p357_p4 = scmp.lt.s32.totalorder %s351_s13, %s351_s13 }
  0x2a   :  { %v42_v11 = vld [vmem:[#allocation2] sm:$0xff]  ;;  %v300_v13 = vld [vmem:[#allocation5 + $0x28] sm:$0xff]   ;;  %v301_v14 = vld [vmem:[#allocation5 + $0x70] sm:$0xff]  }
  0x2b   :  { %v245_v12 = vcombine.high %v42_v11, %v42_v11  ;;  %v302_v15 = vld [vmem:[#allocation5 + $0x30] sm:$0xff]   ;;  %v303_v16 = vld [vmem:[#allocation5 + $0x78] sm:$0xff]   ;;  %v244_v18 = vcombine.low %v42_v11, %v42_v11  ;;  %p358_p5 = por %p357_p4, %p356_p3 }
  0x2c   :  { %265 = vmatpush3.bf16.msra.mxu0 %v292_v3  ;;  %v304_v17 = vld [vmem:[#allocation5 + $0x38] sm:$0xff]  }
  0x2d   :  { %266 = vmatprep.subr.bf16.mxu0 %v293_v4  ;;  %217 = vmatprep.mubr.bf16.mxu0 %v245_v12  ;;  %v243_v20 = vld [vmem:[%s452_s2] ss:$0 sm:$0xff]  ;;  %p359_p6 = pnand %p358_p5, %p352_p2 }
  0x30   :  { %267 = vmatpush3.bf16.msra.mxu0 %v294_v5 }
  0x31   :  { %268 = vmatprep.subr.bf16.mxu0 %v295_v6 }
  0x34   :  { %269 = vmatpush3.bf16.msra.mxu0 %v296_v7 }
  0x35   :  { %270 = vmatprep.subr.bf16.mxu0 %v297_v8 }
  0x38   :  { %271 = vmatpush3.bf16.msra.mxu0 %v298_v9 }
  0x39   :  { %272 = vmatprep.subr.bf16.mxu0 %v299_v10 }
  0x3c   :  { %273 = vmatpush3.bf16.msra.mxu0 %v300_v13 }
  0x3d   :  { %274 = vmatprep.subr.bf16.mxu0 %v301_v14 }
  0x40   :  { %275 = vmatpush3.bf16.msra.mxu0 %v302_v15 }
  0x41   :  { %276 = vmatprep.subr.bf16.mxu0 %v303_v16 }
  0x44   :  { %277 = vmatpush3.bf16.msra.mxu0 %v304_v17 }
  0x47   :  { %218 = vmatmul.mubr.bf16.vlgmr.msra.gmra.mrb[0].mxu0 %v244_v18 }
 0x11a   :  { %v278_v19 = vpop.f32.mrb[0].mxu0 }
 0x11b   :  { %v279_v21 = vpop.f32.mrb[1].mxu0 }
 0x11c   :  { %v280_v22 = vadd.f32 %v279_v21, %v278_v19  ;;  %v281_v23 = vpop.f32.mrb[2].mxu0 }
 0x11d   :  { %v282_v24 = vpop.f32.mrb[3].mxu0 }
 0x11e   :  { %v220_v25 = vadd.f32 %v280_v22, %v243_v20 }
 0x120   :  { %v225_v26 = vmax.f32 %v220_v25, 0.0 }
 0x122   :  { %226 = vst [vmem:[#allocation7] sm:$0xff] %v225_v26 }
 0x123   :  { %362 = shalt.err (!%p359_p6)
}
 0x124   :  { %s363_s2 = scalar_lea.hbm %s453_s3, 128 }
 0x125   :  { %p364_p7 = scmp.ne.s32.totalorder %s453_s3, %s363_s2  ;;  %p367_p8 = scmp.lt.u32.totalorder %s363_s2, %s453_s3 }
 0x127   :  { %p369_p9 = pnand %p367_p8, %p364_p7 }
 0x129   :  { %372 = shalt.err (!%p369_p9)
}
 0x12a   :  { %236 = dma.vmem_to_hbm [thread:$0]  %s234_s12, 128, %s453_s3, [#allocation4]  }
 0x12b   :  { %377 = dma.done.wait [#allocation4], 128  }
 0x12c   :  { %378 = vsyncadd [#allocation4], 4294967168 }
 0x12d   :  { %240 = vsyncpa [#allocation3], 1 }
 0x12e   :  { %241 = vsyncpa [#allocation6], 1 }
 0x12f   :  { %242 = vsyncpa [#allocation4], 1 }

</bundles_post_ra>
